<compile_context>
chip_gen: v7x
topology: tpu7x:2x2x1
jax: 0.10.0
libtpu: 0.0.40
codegen_flags: <defaults>
</compile_context>

<pallas_src>
import functools

import numpy as np
import jax
import jax.numpy as jnp
from jax import lax
from jax.experimental import pallas as pl
from jax.experimental.pallas import tpu as pltpu


class ConstantTransition:
    REDUCE = 2
    SHIFT = 3


def _bucket(n, minimum=8):
    """Round up to a power of two (>= minimum, hence a multiple of 8)."""
    n = max(int(n), 1)
    return max(minimum, 1 << (n - 1).bit_length())


def _round_up(n, m):
    return ((n + m - 1) // m) * m


# ---------------------------------------------------------------------------
# Fused kernel: leaf DMA + reduce schedule + slab gather + fused linear + tanh
# ---------------------------------------------------------------------------
def _tree_attention_kernel(
        # scalar-prefetch refs (SMEM, int32), each of length n_red_pad
        left_ref, right_ref, parent_ref,
        # inputs
        leaves_hbm,    # (n_leaves_pad, Hp) in ANY/HBM -> DMA'd straight into the pool
        hid_ref,       # (B_pad, Hp) VMEM, zero-padded decoder hidden state
        w2_ref,        # (2*Hp, Hp) VMEM, fused pre-transposed attn_out weight
        # output
        out_ref,       # (B_pad, Hp) VMEM, lane-dense
        # scratch
        pool_ref,      # (n_leaves_pad + n_red_pad, Hp) VMEM row pool
        cat_ref,       # (B_pad, 2*Hp) VMEM fused-concat slab
        sem,           # (1,) DMA semaphore
        *, n_leaves_pad, n_red_pad, b_pad, hp):
    # 1) Leaf rows straight from HBM into the head of the row pool (no VMEM->VMEM copy).
    cp = pltpu.make_async_copy(
        leaves_hbm, pool_ref.at[pl.ds(0, n_leaves_pad)], sem.at[0])
    cp.start()
    cp.wait()

    # 2) Reduce schedule.  The reference softmax weights are exactly [0.5, 0.5]
    #    (context is identically zero), so: b_parent = 0.5*b_left + 0.5*b_right + parent.
    #    Reduce k writes pool row n_leaves_pad + k.  Entries beyond the real reduce count
    #    are (a) harmless zero-row dummies and (b) B_pad trailing "copy" entries
    #    (0.5*x + 0.5*x + 0 == x) that park each example's final stack top in the last
    #    B_pad pool rows.
    UNROLL = 8  # n_red_pad is a power of two >= 8, so this divides evenly.

    def body(j, carry):
        base = j * UNROLL
        for u in range(UNROLL):
            k = base + u
            li = left_ref[k]
            ri = right_ref[k]
            pi = parent_ref[k]
            row = (pool_ref[pl.ds(li, 1), :] * 0.5
                   + pool_ref[pl.ds(ri, 1), :] * 0.5
                   + pool_ref[pl.ds(pi, 1), :])
            pool_ref[pl.ds(n_leaves_pad + k, 1), :] = row
        return carry

    lax.fori_loop(0, n_red_pad // UNROLL, body, 0)

    # 3) Gather: the final slab is the last b_pad pool rows (static, 8-aligned slice);
    #    the concat with hidden is materialized with two lane-aligned slab stores.
    final_base = n_leaves_pad + n_red_pad - b_pad
    cat_ref[:, 0:hp] = pool_ref[pl.ds(final_base, b_pad), :]
    cat_ref[:, hp:2 * hp] = hid_ref[...]

    # 4) attn_out linear fused into one K=2*Hp MXU contraction, then tanh.
    acc = jnp.dot(cat_ref[...], w2_ref[...], preferred_element_type=jnp.float32)
    out_ref[...] = jnp.tanh(acc).astype(out_ref.dtype)


@functools.partial(
    jax.jit,
    static_argnames=("b", "h", "b_pad", "hp", "n_leaves_pad", "n_red_pad"))
def _tree_attention_fused(left_ids, right_ids, parent_ids, leaves, hidden, w2,
                          *, b, h, b_pad, hp, n_leaves_pad, n_red_pad):
    pool_rows = n_leaves_pad + n_red_pad

    # Pad the decoder hidden state to the lane-dense / sublane-aligned slab inside the jit.
    hid_pad = jnp.zeros((b_pad, hp), jnp.float32).at[:b, :h].set(
        hidden.astype(jnp.float32))

    kernel = functools.partial(
        _tree_attention_kernel,
        n_leaves_pad=n_leaves_pad, n_red_pad=n_red_pad, b_pad=b_pad, hp=hp)

    # Explicit scoped-VMEM budget: pool + cat scratch + (double-buffered) small inputs/output.
    vmem_bytes = 4 * (pool_rows * hp + b_pad * 2 * hp
                      + 2 * (b_pad * hp) + 2 * (2 * hp * hp) + 2 * (b_pad * hp))
    vmem_limit = int(min(64 * 1024 * 1024, max(2 * vmem_bytes, 8 * 1024 * 1024)))

    grid_spec = pltpu.PrefetchScalarGridSpec(
        num_scalar_prefetch=3,
        grid=(1,),
        in_specs=[
            pl.BlockSpec(memory_space=pl.ANY),                  # leaves stay in HBM
            pl.BlockSpec((b_pad, hp), lambda i, *_: (0, 0)),    # padded hidden
            pl.BlockSpec((2 * hp, hp), lambda i, *_: (0, 0)),   # fused attn_out weight
        ],
        out_specs=pl.BlockSpec((b_pad, hp), lambda i, *_: (0, 0)),
        scratch_shapes=[
            pltpu.VMEM((pool_rows, hp), jnp.float32),           # row pool
            pltpu.VMEM((b_pad, 2 * hp), jnp.float32),           # fused concat slab
            pltpu.SemaphoreType.DMA((1,)),
        ],
    )

    out = pl.pallas_call(
        kernel,
        grid_spec=grid_spec,
        out_shape=jax.ShapeDtypeStruct((b_pad, hp), jnp.float32),
        compiler_params=pltpu.CompilerParams(
            dimension_semantics=("arbitrary",),
            vmem_limit_bytes=vmem_limit),
    )(left_ids, right_ids, parent_ids, leaves, hid_pad, w2)

    return out[:b, :h]


# ---------------------------------------------------------------------------
# Host-side (NumPy) schedule builder: walks the shift/reduce machine over row IDs only.
# ---------------------------------------------------------------------------
def _build_schedule(transitions, lengths, n_leaves_pad, b_pad):
    """Returns int32 tables (left, right, parent) of length n_red_pad and n_red_pad itself.

    Entry layout:
      [0, n_red)                      real reduces (output row = n_leaves_pad + k)
      [n_red, n_red_pad - b_pad)      zero-row dummies (bucket padding)
      [n_red_pad - b_pad, n_red_pad)  copies parking final stack tops in the last b_pad rows
    """
    T, B = transitions.shape
    starts, s = [], 0
    for l in lengths:
        starts.append(s)
        s += l
    n_leaves = s
    zero_id = n_leaves          # first zero-padded leaf row (< n_leaves_pad by construction)

    buffers = [list(range(starts[b], starts[b] + lengths[b])) for b in range(B)]
    b_stacks = [[] for _ in range(B)]
    left_ids, right_ids, parent_ids = [], [], []
    next_id = n_leaves_pad      # reduce outputs live at pool rows n_leaves_pad + k

    for i in range(T):
        for b in range(B):
            t = int(transitions[i, b])
            if t == ConstantTransition.REDUCE:
                right = b_stacks[b].pop()
                left = b_stacks[b].pop()
                parent = buffers[b][-1]            # peek (not pop), as in the reference
                left_ids.append(left)
                right_ids.append(right)
                parent_ids.append(parent)
                b_stacks[b].append(next_id)
                next_id += 1
            elif t == ConstantTransition.SHIFT:
                b_stacks[b].append(buffers[b].pop())   # pop from the END, as in the reference

    final_ids = [b_stacks[b].pop() for b in range(B)]
    n_red = len(left_ids)
    n_red_pad = _bucket(n_red + b_pad)

    # Dummy padding entries (write zeros into spare rows nobody reads).
    n_dummy = n_red_pad - b_pad - n_red
    left_ids += [zero_id] * n_dummy
    right_ids += [zero_id] * n_dummy
    parent_ids += [zero_id] * n_dummy

    # Trailing copy entries: 0.5*x + 0.5*x + 0 == x parks finals at the slab rows.
    for j in range(b_pad):
        fid = final_ids[j] if j < B else zero_id
        left_ids.append(fid)
        right_ids.append(fid)
        parent_ids.append(zero_id)

    to_arr = lambda lst: np.asarray(lst, np.int32)
    return to_arr(left_ids), to_arr(right_ids), to_arr(parent_ids), n_red_pad


# ---------------------------------------------------------------------------
# TreeGuidedAttention (forward-pass only)
# ---------------------------------------------------------------------------
class TreeGuidedAttention:
    def __init__(self, hidden_dim, key):
        self.hidden_dim = hidden_dim
        self.hp = _round_up(hidden_dim, 128)   # lane-dense feature dim
        # nn.Linear(hidden_dim*2, hidden_dim, bias=False): U(-1/sqrt(in), 1/sqrt(in))
        bound = 1.0 / float(np.sqrt(2 * hidden_dim))
        w = jax.random.uniform(
            key, (hidden_dim, 2 * hidden_dim),
            minval=-bound, maxval=bound, dtype=jnp.float32)
        self.attn_out_weight = w               # reference layout (H, 2H)

        # Fused, pre-transposed, lane-padded weight: out = cat([attn, hidden]_padded) @ w2
        w_np = np.asarray(w, np.float32)
        w2 = np.zeros((2 * self.hp, self.hp), np.float32)
        w2[:hidden_dim, :hidden_dim] = w_np[:, :hidden_dim].T
        w2[self.hp:self.hp + hidden_dim, :hidden_dim] = w_np[:, hidden_dim:].T
        self.w2 = jnp.asarray(w2)

    def forward(self, hidden, stack_context, transitions):
        # NOTE: the reference's attn_forward builds `context` as all-zeros, so the
        # AttnReducer softmax weights are exactly [0.5, 0.5]; that constant is folded
        # into the kernel.  If upstream ever supplies a non-zero context, this folding
        # must be revisited.
        # `transitions` stays host-side NumPy: the schedule walk is pure Python control
        # flow; a device array here would force per-element device->host syncs.
        transitions = np.asarray(transitions)

        B = len(stack_context)
        H = self.hidden_dim
        Hp = self.hp
        lengths = [len(sc) for sc in stack_context]
        n_leaves = int(sum(lengths))

        B_pad = _bucket(B)
        n_leaves_pad = _bucket(n_leaves + 1)   # +1 guarantees a zero row at index n_leaves

        left_ids, right_ids, parent_ids, n_red_pad = _build_schedule(
            transitions, lengths, n_leaves_pad, B_pad)

        # Assemble the leaf table host-side in one shot (single transfer to device),
        # zero-padded to (n_leaves_pad, Hp); leaf id == flattened row index.
        host_rows = jax.device_get([row for sc in stack_context for row in sc])
        leaves_np = np.zeros((n_leaves_pad, Hp), np.float32)
        for r, row in enumerate(host_rows):
            leaves_np[r, :H] = np.asarray(row, np.float32).reshape(H)

        out = _tree_attention_fused(
            jnp.asarray(left_ids), jnp.asarray(right_ids), jnp.asarray(parent_ids),
            jnp.asarray(leaves_np), hidden, self.w2,
            b=B, h=H, b_pad=B_pad, hp=Hp,
            n_leaves_pad=n_leaves_pad, n_red_pad=n_red_pad)
        return out, None


# ---------------------------------------------------------------------------
# Pure-NumPy reference of the original PyTorch semantics (for a correctness check)
# ---------------------------------------------------------------------------
def _numpy_reference(hidden, stack_context, transitions, weight):
    hidden = np.asarray(hidden, np.float32)
    weight = np.asarray(weight, np.float32)
    B = len(stack_context)
    buffers = [[np.asarray(row, np.float32).reshape(-1) for row in sc] for sc in stack_context]
    b_stacks = [[] for _ in range(B)]
    T = transitions.shape[0]
    for i in range(T):
        for b in range(B):
            t = int(transitions[i, b])
            if t == ConstantTransition.REDUCE:
                right = b_stacks[b].pop()
                left = b_stacks[b].pop()
                parent = buffers[b][-1]
                # softmax([0, 0]) == [0.5, 0.5] in the reference (context is all zeros)
                b_stacks[b].append(0.5 * left + 0.5 * right + parent)
            elif t == ConstantTransition.SHIFT:
                b_stacks[b].append(buffers[b].pop())
    attn_output = np.stack([b_stacks[b].pop() for b in range(B)], axis=0)
    x = np.concatenate([attn_output, hidden], axis=1)
    return np.tanh(x @ weight.T)


if __name__ == "__main__":
    B = 2          # batch
    H = 32         # hidden_dim
    L = 6          # buffer length (tokens per example)
    key = jax.random.PRNGKey(0)
    k_w, k_h, k_c, k_h2 = jax.random.split(key, 4)

    model = TreeGuidedAttention(H, k_w)

    hidden = jax.random.normal(k_h, (B, H), dtype=jnp.float32)
    ctx = jax.random.normal(k_c, (B, L, H), dtype=jnp.float32)
    # stack_context: list over batch of list of (1, H) rows (matches the PyTorch interface)
    stack_context = [[ctx[b, t].reshape(1, H) for t in range(L)] for b in range(B)]

    # valid shift/reduce sequence (buffer of 6 never empties), per batch,
    # stored as (num_transitions, batch) -- host NumPy control data.
    S, R = ConstantTransition.SHIFT, ConstantTransition.REDUCE
    per_example = [S, S, R, S, R, S, R, S, R]         # 9 transitions, 4 reduces / example
    transitions = np.stack([per_example] * B, axis=1).astype(np.int32)  # (9, B)

    out, _ = model.forward(hidden, stack_context, transitions)
    out = jax.block_until_ready(out)
    assert out.shape == (B, H) and out.dtype == jnp.float32

    ref = _numpy_reference(hidden, stack_context, transitions, model.attn_out_weight)
    np.testing.assert_allclose(np.asarray(out), ref, rtol=1e-3, atol=1e-3)

    # Second call (new decoder state, same bucket sizes) reuses the compiled kernel.
    hidden2 = jax.random.normal(k_h2, (B, H), dtype=jnp.float32)
    out2, _ = model.forward(hidden2, stack_context, transitions)
    out2 = jax.block_until_ready(out2)
    ref2 = _numpy_reference(hidden2, stack_context, transitions, model.attn_out_weight)
    np.testing.assert_allclose(np.asarray(out2), ref2, rtol=1e-3, atol=1e-3)

    print("KERNEL_OK")
</pallas_src>

<mosaic_0001>
module attributes {stable_mosaic.version = 11 : i64} {
  func.func @_tree_attention_kernel(%arg0: i32, %arg1: memref<16xi32, #tpu.memory_space<smem>>, %arg2: memref<16xi32, #tpu.memory_space<smem>>, %arg3: memref<16xi32, #tpu.memory_space<smem>>, %arg4: memref<16x128xf32, #tpu.memory_space<any>>, %arg5: memref<8x128xf32, #tpu.memory_space<vmem>>, %arg6: memref<256x128xf32, #tpu.memory_space<vmem>>, %arg7: memref<8x128xf32, #tpu.memory_space<vmem>>, %arg8: memref<32x128xf32, #tpu.memory_space<vmem>>, %arg9: memref<8x256xf32, #tpu.memory_space<vmem>>, %arg10: memref<1x!tpu.dma_semaphore, #tpu.memory_space<semaphore_mem>>) attributes {dimension_semantics = [#tpu.dimension_semantics<arbitrary>], iteration_bounds = array<i64: 1>, scalar_prefetch = 3 : i64, scratch_operands = 3 : i64, tpu.core_type = #tpu.core_type<tc>, window_params = [{}, {pipeline_mode = #tpu.pipeline_mode<synchronous>, transform_indices = @transform_1, window_bounds = array<i64: 8, 128>}, {pipeline_mode = #tpu.pipeline_mode<synchronous>, transform_indices = @transform_2, window_bounds = array<i64: 256, 128>}, {pipeline_mode = #tpu.pipeline_mode<synchronous>, transform_indices = @transform_3, window_bounds = array<i64: 8, 128>}]} {
    %c0_i32 = arith.constant 0 : i32
    %c0_i32_0 = arith.constant 0 : i32
    %c0_i32_1 = arith.constant 0 : i32
    %0 = tpu.memref_slice %arg8[%c0_i32_0, %c0_i32_1] : memref<32x128xf32, #tpu.memory_space<vmem>> -> memref<16x128xf32, #tpu.memory_space<vmem>>
    %1 = tpu.memref_slice %arg10[%c0_i32] : memref<1x!tpu.dma_semaphore, #tpu.memory_space<semaphore_mem>> -> memref<1x!tpu.dma_semaphore, #tpu.memory_space<semaphore_mem>>
    %2 = tpu.memref_squeeze %1 : memref<1x!tpu.dma_semaphore, #tpu.memory_space<semaphore_mem>> -> memref<!tpu.dma_semaphore, #tpu.memory_space<semaphore_mem>>
    tpu.enqueue_dma source(%arg4 : memref<16x128xf32, #tpu.memory_space<any>>) target(%0 : memref<16x128xf32, #tpu.memory_space<vmem>>) target_semaphore(%2 : memref<!tpu.dma_semaphore, #tpu.memory_space<semaphore_mem>>)
    %c0_i32_2 = arith.constant 0 : i32
    %c0_i32_3 = arith.constant 0 : i32
    %c0_i32_4 = arith.constant 0 : i32
    %3 = tpu.memref_slice %arg8[%c0_i32_3, %c0_i32_4] : memref<32x128xf32, #tpu.memory_space<vmem>> -> memref<16x128xf32, #tpu.memory_space<vmem>>
    %4 = tpu.memref_slice %arg10[%c0_i32_2] : memref<1x!tpu.dma_semaphore, #tpu.memory_space<semaphore_mem>> -> memref<1x!tpu.dma_semaphore, #tpu.memory_space<semaphore_mem>>
    %5 = tpu.memref_squeeze %4 : memref<1x!tpu.dma_semaphore, #tpu.memory_space<semaphore_mem>> -> memref<!tpu.dma_semaphore, #tpu.memory_space<semaphore_mem>>
    tpu.wait_dma2 semaphore(%5 : memref<!tpu.dma_semaphore, #tpu.memory_space<semaphore_mem>>) src(%arg4 : memref<16x128xf32, #tpu.memory_space<any>>) dst(%3 : memref<16x128xf32, #tpu.memory_space<vmem>>)
    %c0_i32_5 = arith.constant 0 : i32
    %c2_i32 = arith.constant 2 : i32
    %6 = arith.addi %c0_i32_5, %c2_i32 : i32
    %c1_i32 = arith.constant 1 : i32
    scf.for %arg11 = %c0_i32_5 to %6 step %c1_i32  : i32 {
      %c8_i32 = arith.constant 8 : i32
      %16 = arith.muli %arg11, %c8_i32 : i32
      %c0_i32_18 = arith.constant 0 : i32
      %17 = arith.addi %16, %c0_i32_18 : i32
      %18 = arith.index_cast %17 : i32 to index
      %19 = memref.load %arg1[%18] : memref<16xi32, #tpu.memory_space<smem>>
      %20 = arith.index_cast %17 : i32 to index
      %21 = memref.load %arg2[%20] : memref<16xi32, #tpu.memory_space<smem>>
      %22 = arith.index_cast %17 : i32 to index
      %23 = memref.load %arg3[%22] : memref<16xi32, #tpu.memory_space<smem>>
      %24 = arith.index_cast %19 : i32 to index
      %c0_19 = arith.constant 0 : index
      %25 = vector.load %arg8[%24, %c0_19] : memref<32x128xf32, #tpu.memory_space<vmem>>, vector<1x128xf32>
      %cst_20 = arith.constant 5.000000e-01 : f32
      %26 = vector.broadcast %cst_20 : f32 to vector<1x128xf32>
      %27 = arith.mulf %25, %26 : vector<1x128xf32>
      %28 = arith.index_cast %21 : i32 to index
      %c0_21 = arith.constant 0 : index
      %29 = vector.load %arg8[%28, %c0_21] : memref<32x128xf32, #tpu.memory_space<vmem>>, vector<1x128xf32>
      %cst_22 = arith.constant 5.000000e-01 : f32
      %30 = vector.broadcast %cst_22 : f32 to vector<1x128xf32>
      %31 = arith.mulf %29, %30 : vector<1x128xf32>
      %32 = arith.addf %27, %31 : vector<1x128xf32>
      %33 = arith.index_cast %23 : i32 to index
      %c0_23 = arith.constant 0 : index
      %34 = vector.load %arg8[%33, %c0_23] : memref<32x128xf32, #tpu.memory_space<vmem>>, vector<1x128xf32>
      %35 = arith.addf %32, %34 : vector<1x128xf32>
      %c16_i32 = arith.constant 16 : i32
      %36 = arith.addi %c16_i32, %17 : i32
      %37 = arith.index_cast %36 : i32 to index
      %c0_24 = arith.constant 0 : index
      %38 = vector.load %arg8[%37, %c0_24] : memref<32x128xf32, #tpu.memory_space<vmem>>, vector<1x128xf32>
      tpu.vector_store %arg8[%37, %c0_24], %35 {strides = array<i32>} : memref<32x128xf32, #tpu.memory_space<vmem>>, vector<1x128xf32>,
      %c1_i32_25 = arith.constant 1 : i32
      %39 = arith.addi %16, %c1_i32_25 : i32
      %40 = arith.index_cast %39 : i32 to index
      %41 = memref.load %arg1[%40] : memref<16xi32, #tpu.memory_space<smem>>
      %42 = arith.index_cast %39 : i32 to index
      %43 = memref.load %arg2[%42] : memref<16xi32, #tpu.memory_space<smem>>
      %44 = arith.index_cast %39 : i32 to index
      %45 = memref.load %arg3[%44] : memref<16xi32, #tpu.memory_space<smem>>
      %46 = arith.index_cast %41 : i32 to index
      %c0_26 = arith.constant 0 : index
      %47 = vector.load %arg8[%46, %c0_26] : memref<32x128xf32, #tpu.memory_space<vmem>>, vector<1x128xf32>
      %cst_27 = arith.constant 5.000000e-01 : f32
      %48 = vector.broadcast %cst_27 : f32 to vector<1x128xf32>
      %49 = arith.mulf %47, %48 : vector<1x128xf32>
      %50 = arith.index_cast %43 : i32 to index
      %c0_28 = arith.constant 0 : index
      %51 = vector.load %arg8[%50, %c0_28] : memref<32x128xf32, #tpu.memory_space<vmem>>, vector<1x128xf32>
      %cst_29 = arith.constant 5.000000e-01 : f32
      %52 = vector.broadcast %cst_29 : f32 to vector<1x128xf32>
      %53 = arith.mulf %51, %52 : vector<1x128xf32>
      %54 = arith.addf %49, %53 : vector<1x128xf32>
      %55 = arith.index_cast %45 : i32 to index
      %c0_30 = arith.constant 0 : index
      %56 = vector.load %arg8[%55, %c0_30] : memref<32x128xf32, #tpu.memory_space<vmem>>, vector<1x128xf32>
      %57 = arith.addf %54, %56 : vector<1x128xf32>
      %c16_i32_31 = arith.constant 16 : i32
      %58 = arith.addi %c16_i32_31, %39 : i32
      %59 = arith.index_cast %58 : i32 to index
      %c0_32 = arith.constant 0 : index
      %60 = vector.load %arg8[%59, %c0_32] : memref<32x128xf32, #tpu.memory_space<vmem>>, vector<1x128xf32>
      tpu.vector_store %arg8[%59, %c0_32], %57 {strides = array<i32>} : memref<32x128xf32, #tpu.memory_space<vmem>>, vector<1x128xf32>,
      %c2_i32_33 = arith.constant 2 : i32
      %61 = arith.addi %16, %c2_i32_33 : i32
      %62 = arith.index_cast %61 : i32 to index
      %63 = memref.load %arg1[%62] : memref<16xi32, #tpu.memory_space<smem>>
      %64 = arith.index_cast %61 : i32 to index
      %65 = memref.load %arg2[%64] : memref<16xi32, #tpu.memory_space<smem>>
      %66 = arith.index_cast %61 : i32 to index
      %67 = memref.load %arg3[%66] : memref<16xi32, #tpu.memory_space<smem>>
      %68 = arith.index_cast %63 : i32 to index
      %c0_34 = arith.constant 0 : index
      %69 = vector.load %arg8[%68, %c0_34] : memref<32x128xf32, #tpu.memory_space<vmem>>, vector<1x128xf32>
      %cst_35 = arith.constant 5.000000e-01 : f32
      %70 = vector.broadcast %cst_35 : f32 to vector<1x128xf32>
      %71 = arith.mulf %69, %70 : vector<1x128xf32>
      %72 = arith.index_cast %65 : i32 to index
      %c0_36 = arith.constant 0 : index
      %73 = vector.load %arg8[%72, %c0_36] : memref<32x128xf32, #tpu.memory_space<vmem>>, vector<1x128xf32>
      %cst_37 = arith.constant 5.000000e-01 : f32
      %74 = vector.broadcast %cst_37 : f32 to vector<1x128xf32>
      %75 = arith.mulf %73, %74 : vector<1x128xf32>
      %76 = arith.addf %71, %75 : vector<1x128xf32>
      %77 = arith.index_cast %67 : i32 to index
      %c0_38 = arith.constant 0 : index
      %78 = vector.load %arg8[%77, %c0_38] : memref<32x128xf32, #tpu.memory_space<vmem>>, vector<1x128xf32>
      %79 = arith.addf %76, %78 : vector<1x128xf32>
      %c16_i32_39 = arith.constant 16 : i32
      %80 = arith.addi %c16_i32_39, %61 : i32
      %81 = arith.index_cast %80 : i32 to index
      %c0_40 = arith.constant 0 : index
      %82 = vector.load %arg8[%81, %c0_40] : memref<32x128xf32, #tpu.memory_space<vmem>>, vector<1x128xf32>
      tpu.vector_store %arg8[%81, %c0_40], %79 {strides = array<i32>} : memref<32x128xf32, #tpu.memory_space<vmem>>, vector<1x128xf32>,
      %c3_i32 = arith.constant 3 : i32
      %83 = arith.addi %16, %c3_i32 : i32
      %84 = arith.index_cast %83 : i32 to index
      %85 = memref.load %arg1[%84] : memref<16xi32, #tpu.memory_space<smem>>
      %86 = arith.index_cast %83 : i32 to index
      %87 = memref.load %arg2[%86] : memref<16xi32, #tpu.memory_space<smem>>
      %88 = arith.index_cast %83 : i32 to index
      %89 = memref.load %arg3[%88] : memref<16xi32, #tpu.memory_space<smem>>
      %90 = arith.index_cast %85 : i32 to index
      %c0_41 = arith.constant 0 : index
      %91 = vector.load %arg8[%90, %c0_41] : memref<32x128xf32, #tpu.memory_space<vmem>>, vector<1x128xf32>
      %cst_42 = arith.constant 5.000000e-01 : f32
      %92 = vector.broadcast %cst_42 : f32 to vector<1x128xf32>
      %93 = arith.mulf %91, %92 : vector<1x128xf32>
      %94 = arith.index_cast %87 : i32 to index
      %c0_43 = arith.constant 0 : index
      %95 = vector.load %arg8[%94, %c0_43] : memref<32x128xf32, #tpu.memory_space<vmem>>, vector<1x128xf32>
      %cst_44 = arith.constant 5.000000e-01 : f32
      %96 = vector.broadcast %cst_44 : f32 to vector<1x128xf32>
      %97 = arith.mulf %95, %96 : vector<1x128xf32>
      %98 = arith.addf %93, %97 : vector<1x128xf32>
      %99 = arith.index_cast %89 : i32 to index
      %c0_45 = arith.constant 0 : index
      %100 = vector.load %arg8[%99, %c0_45] : memref<32x128xf32, #tpu.memory_space<vmem>>, vector<1x128xf32>
      %101 = arith.addf %98, %100 : vector<1x128xf32>
      %c16_i32_46 = arith.constant 16 : i32
      %102 = arith.addi %c16_i32_46, %83 : i32
      %103 = arith.index_cast %102 : i32 to index
      %c0_47 = arith.constant 0 : index
      %104 = vector.load %arg8[%103, %c0_47] : memref<32x128xf32, #tpu.memory_space<vmem>>, vector<1x128xf32>
      tpu.vector_store %arg8[%103, %c0_47], %101 {strides = array<i32>} : memref<32x128xf32, #tpu.memory_space<vmem>>, vector<1x128xf32>,
      %c4_i32 = arith.constant 4 : i32
      %105 = arith.addi %16, %c4_i32 : i32
      %106 = arith.index_cast %105 : i32 to index
      %107 = memref.load %arg1[%106] : memref<16xi32, #tpu.memory_space<smem>>
      %108 = arith.index_cast %105 : i32 to index
      %109 = memref.load %arg2[%108] : memref<16xi32, #tpu.memory_space<smem>>
      %110 = arith.index_cast %105 : i32 to index
      %111 = memref.load %arg3[%110] : memref<16xi32, #tpu.memory_space<smem>>
      %112 = arith.index_cast %107 : i32 to index
      %c0_48 = arith.constant 0 : index
      %113 = vector.load %arg8[%112, %c0_48] : memref<32x128xf32, #tpu.memory_space<vmem>>, vector<1x128xf32>
      %cst_49 = arith.constant 5.000000e-01 : f32
      %114 = vector.broadcast %cst_49 : f32 to vector<1x128xf32>
      %115 = arith.mulf %113, %114 : vector<1x128xf32>
      %116 = arith.index_cast %109 : i32 to index
      %c0_50 = arith.constant 0 : index
      %117 = vector.load %arg8[%116, %c0_50] : memref<32x128xf32, #tpu.memory_space<vmem>>, vector<1x128xf32>
      %cst_51 = arith.constant 5.000000e-01 : f32
      %118 = vector.broadcast %cst_51 : f32 to vector<1x128xf32>
      %119 = arith.mulf %117, %118 : vector<1x128xf32>
      %120 = arith.addf %115, %119 : vector<1x128xf32>
      %121 = arith.index_cast %111 : i32 to index
      %c0_52 = arith.constant 0 : index
      %122 = vector.load %arg8[%121, %c0_52] : memref<32x128xf32, #tpu.memory_space<vmem>>, vector<1x128xf32>
      %123 = arith.addf %120, %122 : vector<1x128xf32>
      %c16_i32_53 = arith.constant 16 : i32
      %124 = arith.addi %c16_i32_53, %105 : i32
      %125 = arith.index_cast %124 : i32 to index
      %c0_54 = arith.constant 0 : index
      %126 = vector.load %arg8[%125, %c0_54] : memref<32x128xf32, #tpu.memory_space<vmem>>, vector<1x128xf32>
      tpu.vector_store %arg8[%125, %c0_54], %123 {strides = array<i32>} : memref<32x128xf32, #tpu.memory_space<vmem>>, vector<1x128xf32>,
      %c5_i32 = arith.constant 5 : i32
      %127 = arith.addi %16, %c5_i32 : i32
      %128 = arith.index_cast %127 : i32 to index
      %129 = memref.load %arg1[%128] : memref<16xi32, #tpu.memory_space<smem>>
      %130 = arith.index_cast %127 : i32 to index
      %131 = memref.load %arg2[%130] : memref<16xi32, #tpu.memory_space<smem>>
      %132 = arith.index_cast %127 : i32 to index
      %133 = memref.load %arg3[%132] : memref<16xi32, #tpu.memory_space<smem>>
      %134 = arith.index_cast %129 : i32 to index
      %c0_55 = arith.constant 0 : index
      %135 = vector.load %arg8[%134, %c0_55] : memref<32x128xf32, #tpu.memory_space<vmem>>, vector<1x128xf32>
      %cst_56 = arith.constant 5.000000e-01 : f32
      %136 = vector.broadcast %cst_56 : f32 to vector<1x128xf32>
      %137 = arith.mulf %135, %136 : vector<1x128xf32>
      %138 = arith.index_cast %131 : i32 to index
      %c0_57 = arith.constant 0 : index
      %139 = vector.load %arg8[%138, %c0_57] : memref<32x128xf32, #tpu.memory_space<vmem>>, vector<1x128xf32>
      %cst_58 = arith.constant 5.000000e-01 : f32
      %140 = vector.broadcast %cst_58 : f32 to vector<1x128xf32>
      %141 = arith.mulf %139, %140 : vector<1x128xf32>
      %142 = arith.addf %137, %141 : vector<1x128xf32>
      %143 = arith.index_cast %133 : i32 to index
      %c0_59 = arith.constant 0 : index
      %144 = vector.load %arg8[%143, %c0_59] : memref<32x128xf32, #tpu.memory_space<vmem>>, vector<1x128xf32>
      %145 = arith.addf %142, %144 : vector<1x128xf32>
      %c16_i32_60 = arith.constant 16 : i32
      %146 = arith.addi %c16_i32_60, %127 : i32
      %147 = arith.index_cast %146 : i32 to index
      %c0_61 = arith.constant 0 : index
      %148 = vector.load %arg8[%147, %c0_61] : memref<32x128xf32, #tpu.memory_space<vmem>>, vector<1x128xf32>
      tpu.vector_store %arg8[%147, %c0_61], %145 {strides = array<i32>} : memref<32x128xf32, #tpu.memory_space<vmem>>, vector<1x128xf32>,
      %c6_i32 = arith.constant 6 : i32
      %149 = arith.addi %16, %c6_i32 : i32
      %150 = arith.index_cast %149 : i32 to index
      %151 = memref.load %arg1[%150] : memref<16xi32, #tpu.memory_space<smem>>
      %152 = arith.index_cast %149 : i32 to index
      %153 = memref.load %arg2[%152] : memref<16xi32, #tpu.memory_space<smem>>
      %154 = arith.index_cast %149 : i32 to index
      %155 = memref.load %arg3[%154] : memref<16xi32, #tpu.memory_space<smem>>
      %156 = arith.index_cast %151 : i32 to index
      %c0_62 = arith.constant 0 : index
      %157 = vector.load %arg8[%156, %c0_62] : memref<32x128xf32, #tpu.memory_space<vmem>>, vector<1x128xf32>
      %cst_63 = arith.constant 5.000000e-01 : f32
      %158 = vector.broadcast %cst_63 : f32 to vector<1x128xf32>
      %159 = arith.mulf %157, %158 : vector<1x128xf32>
      %160 = arith.index_cast %153 : i32 to index
      %c0_64 = arith.constant 0 : index
      %161 = vector.load %arg8[%160, %c0_64] : memref<32x128xf32, #tpu.memory_space<vmem>>, vector<1x128xf32>
      %cst_65 = arith.constant 5.000000e-01 : f32
      %162 = vector.broadcast %cst_65 : f32 to vector<1x128xf32>
      %163 = arith.mulf %161, %162 : vector<1x128xf32>
      %164 = arith.addf %159, %163 : vector<1x128xf32>
      %165 = arith.index_cast %155 : i32 to index
      %c0_66 = arith.constant 0 : index
      %166 = vector.load %arg8[%165, %c0_66] : memref<32x128xf32, #tpu.memory_space<vmem>>, vector<1x128xf32>
      %167 = arith.addf %164, %166 : vector<1x128xf32>
      %c16_i32_67 = arith.constant 16 : i32
      %168 = arith.addi %c16_i32_67, %149 : i32
      %169 = arith.index_cast %168 : i32 to index
      %c0_68 = arith.constant 0 : index
      %170 = vector.load %arg8[%169, %c0_68] : memref<32x128xf32, #tpu.memory_space<vmem>>, vector<1x128xf32>
      tpu.vector_store %arg8[%169, %c0_68], %167 {strides = array<i32>} : memref<32x128xf32, #tpu.memory_space<vmem>>, vector<1x128xf32>,
      %c7_i32 = arith.constant 7 : i32
      %171 = arith.addi %16, %c7_i32 : i32
      %172 = arith.index_cast %171 : i32 to index
      %173 = memref.load %arg1[%172] : memref<16xi32, #tpu.memory_space<smem>>
      %174 = arith.index_cast %171 : i32 to index
      %175 = memref.load %arg2[%174] : memref<16xi32, #tpu.memory_space<smem>>
      %176 = arith.index_cast %171 : i32 to index
      %177 = memref.load %arg3[%176] : memref<16xi32, #tpu.memory_space<smem>>
      %178 = arith.index_cast %173 : i32 to index
      %c0_69 = arith.constant 0 : index
      %179 = vector.load %arg8[%178, %c0_69] : memref<32x128xf32, #tpu.memory_space<vmem>>, vector<1x128xf32>
      %cst_70 = arith.constant 5.000000e-01 : f32
      %180 = vector.broadcast %cst_70 : f32 to vector<1x128xf32>
      %181 = arith.mulf %179, %180 : vector<1x128xf32>
      %182 = arith.index_cast %175 : i32 to index
      %c0_71 = arith.constant 0 : index
      %183 = vector.load %arg8[%182, %c0_71] : memref<32x128xf32, #tpu.memory_space<vmem>>, vector<1x128xf32>
      %cst_72 = arith.constant 5.000000e-01 : f32
      %184 = vector.broadcast %cst_72 : f32 to vector<1x128xf32>
      %185 = arith.mulf %183, %184 : vector<1x128xf32>
      %186 = arith.addf %181, %185 : vector<1x128xf32>
      %187 = arith.index_cast %177 : i32 to index
      %c0_73 = arith.constant 0 : index
      %188 = vector.load %arg8[%187, %c0_73] : memref<32x128xf32, #tpu.memory_space<vmem>>, vector<1x128xf32>
      %189 = arith.addf %186, %188 : vector<1x128xf32>
      %c16_i32_74 = arith.constant 16 : i32
      %190 = arith.addi %c16_i32_74, %171 : i32
      %191 = arith.index_cast %190 : i32 to index
      %c0_75 = arith.constant 0 : index
      %192 = vector.load %arg8[%191, %c0_75] : memref<32x128xf32, #tpu.memory_space<vmem>>, vector<1x128xf32>
      tpu.vector_store %arg8[%191, %c0_75], %189 {strides = array<i32>} : memref<32x128xf32, #tpu.memory_space<vmem>>, vector<1x128xf32>,
    }
    %c2_i32_6 = arith.constant 2 : i32
    %c24 = arith.constant 24 : index
    %c0 = arith.constant 0 : index
    %7 = vector.load %arg8[%c24, %c0] : memref<32x128xf32, #tpu.memory_space<vmem>>, vector<8x128xf32>
    %c0_7 = arith.constant 0 : index
    %c0_8 = arith.constant 0 : index
    %8 = vector.load %arg9[%c0_7, %c0_8] : memref<8x256xf32, #tpu.memory_space<vmem>>, vector<8x128xf32>
    tpu.vector_store %arg9[%c0_7, %c0_8], %7 {strides = array<i32>} : memref<8x256xf32, #tpu.memory_space<vmem>>, vector<8x128xf32>,
    %c0_9 = arith.constant 0 : index
    %c0_10 = arith.constant 0 : index
    %9 = vector.load %arg5[%c0_9, %c0_10] : memref<8x128xf32, #tpu.memory_space<vmem>>, vector<8x128xf32>
    %c0_11 = arith.constant 0 : index
    %c128 = arith.constant 128 : index
    %10 = vector.load %arg9[%c0_11, %c128] : memref<8x256xf32, #tpu.memory_space<vmem>>, vector<8x128xf32>
    tpu.vector_store %arg9[%c0_11, %c128], %9 {strides = array<i32>} : memref<8x256xf32, #tpu.memory_space<vmem>>, vector<8x128xf32>,
    %c0_12 = arith.constant 0 : index
    %c0_13 = arith.constant 0 : index
    %11 = vector.load %arg9[%c0_12, %c0_13] : memref<8x256xf32, #tpu.memory_space<vmem>>, vector<8x256xf32>
    %c0_14 = arith.constant 0 : index
    %c0_15 = arith.constant 0 : index
    %12 = vector.load %arg6[%c0_14, %c0_15] : memref<256x128xf32, #tpu.memory_space<vmem>>, vector<256x128xf32>
    %cst = arith.constant dense<0.000000e+00> : vector<8x128xf32>
    %13 = tpu.matmul %11, %12, %cst {dimension_numbers = #tpu.dot_dimension_numbers<[1], [0], [0], [1], [0, 0, 1, 1], [], []>} : vector<8x256xf32>, vector<256x128xf32>, vector<8x128xf32> -> vector<8x128xf32>
    %14 = math.tanh %13 : vector<8x128xf32>
    %c0_16 = arith.constant 0 : index
    %c0_17 = arith.constant 0 : index
    %15 = vector.load %arg7[%c0_16, %c0_17] : memref<8x128xf32, #tpu.memory_space<vmem>>, vector<8x128xf32>
    tpu.vector_store %arg7[%c0_16, %c0_17], %14 {strides = array<i32>} : memref<8x128xf32, #tpu.memory_space<vmem>>, vector<8x128xf32>,
    return
  }
  func.func @transform_1(%arg0: i32, %arg1: memref<16xi32, #tpu.memory_space<smem>>, %arg2: memref<16xi32, #tpu.memory_space<smem>>, %arg3: memref<16xi32, #tpu.memory_space<smem>>) -> (i32, i32) {
    %c0_i32 = arith.constant 0 : i32
    %c0_i32_0 = arith.constant 0 : i32
    %c0_i32_1 = arith.constant 0 : i32
    return %c0_i32, %c0_i32_0 : i32, i32
  }
  func.func @transform_2(%arg0: i32, %arg1: memref<16xi32, #tpu.memory_space<smem>>, %arg2: memref<16xi32, #tpu.memory_space<smem>>, %arg3: memref<16xi32, #tpu.memory_space<smem>>) -> (i32, i32) {
    %c0_i32 = arith.constant 0 : i32
    %c0_i32_0 = arith.constant 0 : i32
    %c0_i32_1 = arith.constant 0 : i32
    return %c0_i32, %c0_i32_0 : i32, i32
  }
  func.func @transform_3(%arg0: i32, %arg1: memref<16xi32, #tpu.memory_space<smem>>, %arg2: memref<16xi32, #tpu.memory_space<smem>>, %arg3: memref<16xi32, #tpu.memory_space<smem>>) -> (i32, i32) {
    %c0_i32 = arith.constant 0 : i32
    %c0_i32_0 = arith.constant 0 : i32
    %c0_i32_1 = arith.constant 0 : i32
    return %c0_i32, %c0_i32_0 : i32, i32
  }
}

</mosaic_0001>

<bundles_post_ra>
// kernel: _tree_attention_fused.1
= control target key start
LH: loop header
LB: loop body
LE: loop exit
PB: predicated region body
PF: predicated region fallthrough
CT: control target
= control target key end

     0   :  { %s693_s0 = inlined_call_operand.vmem [shape: s32[16], index: 0, kind: input, shape index: {}]   ;;  %s694_s3 = inlined_call_operand.vmem [shape: f32[16,128], index: 3, kind: input, shape index: {}]   ;;  %s695_s4 = inlined_call_operand.vmem [shape: f32[8,128], index: 4, kind: input, shape index: {}]   ;;  %s696_s5 = inlined_call_operand.hbm [shape: f32[256,128], index: 5, kind: input, shape index: {}]   ;;  %s697_s6 = inlined_call_operand.vmem [shape: f32[8,128], index: 6, kind: output, shape index: {}]   ;;  %s698_s1 = inlined_call_operand.vmem [shape: s32[16], index: 1, kind: input, shape index: {}]   ;;  %s699_s2 = inlined_call_operand.vmem [shape: s32[16], index: 2, kind: input, shape index: {}]  }
   0x1   :  { %s11_s23 = sshll.u32 %s693_s0, 4  ;;  %s15_s26 = sshll.u32 %s698_s1, 4  ;;  %s12_s23 = int_to_ptr.vmem [resolvable:$true] %s11_s23  ;;  %s16_s26 = int_to_ptr.vmem [resolvable:$true] %s15_s26 }
   0x2   :  { %s515_s27 = scalar_lea.vmem %s12_s23, 16  ;;  %p520_p1 = scmp.lt.s32.totalorder %s12_s23, %s12_s23 }
   0x3   :  { %p516_p0 = scmp.ne.s32.totalorder %s12_s23, %s515_s27  ;;  %p521_p2 = scmp.lt.s32.totalorder %s515_s27, %s515_s27 }
   0x5   :  { %p522_p3 = por %p521_p2, %p520_p1 }
   0x7   :  { %p523_p4 = pnand %p522_p3, %p516_p0 }
   0x9   :  { %526 = shalt.err (!%p523_p4)  }
   0xa   :  { %s587_s28 = smov [#allocation6]   ;;  %s527_s29 = scalar_lea.vmem %s16_s26, 16 }
   0xb   :  { %14 = dma.vmem_to_smem %s12_s23, 16, %s587_s28, [#allocation5] }
   0xc   :  { %p528_p5 = scmp.ne.s32.totalorder %s16_s26, %s527_s29  ;;  %p532_p6 = scmp.lt.s32.totalorder %s16_s26, %s16_s26 }
   0xd   :  { %p533_p7 = scmp.lt.s32.totalorder %s527_s29, %s527_s29 }
   0xf   :  { %p534_p8 = por %p533_p7, %p532_p6 }
  0x11   :  { %p535_p9 = pnand %p534_p8, %p528_p5 }
  0x13   :  { %538 = shalt.err (!%p535_p9)  }
  0x14   :  { %s588_s0 = smov [#allocation7]   ;;  %s19_s7 = sshll.u32 %s699_s2, 4  ;;  %s20_s7 = int_to_ptr.vmem [resolvable:$true] %s19_s7 }
  0x15   :  { %18 = dma.vmem_to_smem %s16_s26, 16, %s588_s0, [#allocation5] }
  0x16   :  { %s539_s8 = scalar_lea.vmem %s20_s7, 16  ;;  %p544_p11 = scmp.lt.s32.totalorder %s20_s7, %s20_s7 }
  0x17   :  { %p540_p10 = scmp.ne.s32.totalorder %s20_s7, %s539_s8  ;;  %p545_p12 = scmp.lt.s32.totalorder %s539_s8, %s539_s8 }
  0x19   :  { %p546_p13 = por %p545_p12, %p544_p11 }
  0x1b   :  { %p547_p0 = pnand %p546_p13, %p540_p10 }
  0x1d   :  { %550 = shalt.err (!%p547_p0)  }
  0x1e   :  { %s589_s9 = smov [#allocation8]  }
  0x1f   :  { %22 = dma.vmem_to_smem %s20_s7, 16, %s589_s9, [#allocation5] }
  0x20   :  { %577 = dma.done.wait [#allocation5], 48 }
  0x21   :  { %578 = vsyncadd [#allocation5], 4294967248 }
  0x22   :  { %24 = sfence }
  0x23   :  { %25 = vsyncpa [#allocation10], 0  ;;  %s590_s10 = smov [#allocation9]   ;;  %s551_s2 = scalar_lea.hbm %s696_s5, 4096 }
  0x24   :  { %s33_s11 = sshll.u32 %s590_s10, 4  ;;  %p552_p1 = scmp.ne.s32.totalorder %s696_s5, %s551_s2  ;;  %s34_s11 = int_to_ptr.vmem [resolvable:$true] %s33_s11 }
  0x25   :  { %p555_p2 = scmp.lt.u32.totalorder %s551_s2, %s696_s5 }
  0x27   :  { %p557_p3 = pnand %p555_p2, %p552_p1 }
  0x29   :  { %560 = shalt.err (!%p557_p3)
}
  0x2a   :  { %s561_s18 = scalar_lea.vmem %s34_s11, 4096  ;;  %p566_p5 = scmp.lt.s32.totalorder %s34_s11, %s34_s11 }
  0x2b   :  { %p562_p4 = scmp.ne.s32.totalorder %s34_s11, %s561_s18  ;;  %p567_p6 = scmp.lt.s32.totalorder %s561_s18, %s561_s18 }
  0x2d   :  { %p568_p7 = por %p567_p6, %p566_p5 }
  0x2f   :  { %p569_p8 = pnand %p568_p7, %p562_p4 }
  0x31   :  { %572 = shalt.err (!%p569_p8)
}
  0x32   :  { %s591_s19 = smov 128   ;;  %s592_s20 = smov 8  }
  0x33   :  { %39 = dma.hbm_to_vmem [thread:$0]  %s696_s5, 4096, %s34_s11, [#allocation10], %s591_s19, %s591_s19, %s592_s20  }
  0x34   :  { %579 = dma.done.wait [#allocation10], 4096  }
  0x35   :  { %580 = vsyncadd [#allocation10], 4294963200  ;;  %v75_v0 = vld [vmem:[%s694_s3] sm:$0xff]  ;;  %v77_v1 = vld [vmem:[%s694_s3 + $0x8] sm:$0xff] }
  0x36   :  { %76 = vst [vmem:[#allocation2] sm:$0xff] %v75_v0  ;;  %78 = vst [vmem:[#allocation2 + $0x8] sm:$0xff] %v77_v1 }
  0x37   :  { %86 = vsyncadd [#allocation4], 256 }
  0x38   :  { %581 = dma.done.wait [#allocation4], 256 }
  0x39   :  { %582 = vsyncadd [#allocation4], 4294967040  ;;  %s655_s27 = smov 0  }
  0x3a LB: > { %s661_s5 = sshll.u32 %s585_s27, 3  ;;  %s95_s27 = sadd.s32 1, %s585_s27   ;;  %s585_s27 = sphi %s655_s27, %s95_s27  }
  0x3b   : > { %s97_s3 = sld [smem:[#allocation6 + %s661_s5]]  ;;  %s113_s30 = sadd.s32 1, %s661_s5 }
  0x3c   : > { %s98_s28 = sld [smem:[#allocation7 + %s661_s5]]  ;;  %s668_s10 = scalar_lea.vmem [#allocation2], %s661_s5 }
  0x3d   : > { %s99_s29 = sld [smem:[#allocation8 + %s661_s5]]  ;;  %s130_s2 = sadd.s32 2, %s661_s5 }
  0x3e   : > { %s114_s8 = sld [smem:[#allocation6 + %s113_s30]]  ;;  %s147_s20 = sadd.s32 3, %s661_s5 }
  0x3f   : > { %s115_s9 = sld [smem:[#allocation7 + %s113_s30]]  ;;  %p92_p9 = scmp.ge.s32.totalorder %s95_s27, 2  }
  0x40   : > { %s116_s11 = sld [smem:[#allocation8 + %s113_s30]]  ;;  %v254_v58 = vld [vmem:[#allocation9 + $0x80] sm:$0xff] (%p92_p9)  ;;  %v255_v59 = vld [vmem:[#allocation9 + $0x88] sm:$0xff] (%p92_p9)  ;;  %v256_v63 = vld [vmem:[#allocation9 + $0x90] sm:$0xff] (%p92_p9) }
  0x41   : > { %s100_s0 = scalar_lea.vmem [#allocation2], %s97_s3  ;;  %s131_s14 = sld [smem:[#allocation6 + %s130_s2]]  ;;  %v238_v60 = vld [vmem:[#allocation9] sm:$0xff] (%p92_p9)  ;;  %v467_v61 = vpack.c.bf16 (%p92_p9), %v255_v59, %v254_v58  ;;  %v239_v62 = vld [vmem:[#allocation9 + $0x8] sm:$0xff] (%p92_p9)  ;;  %v257_v0 = vld [vmem:[#allocation9 + $0x98] sm:$0xff] (%p92_p9) }
  0x42   : > { %v101_v2 = vld [vmem:[%s100_s0] sm:$0x1]  ;;  %s103_s1 = scalar_lea.vmem [#allocation2], %s98_s28  ;;  %s132_s15 = sld [smem:[#allocation7 + %s130_s2]]  ;;  %v469_v1 = vpack.c.bf16 (%p92_p9), %v239_v62, %v238_v60 }
  0x43   : > { %v104_v3 = vld [vmem:[%s103_s1] sm:$0x1]  ;;  %v102_v4 = vmul.f32 0.5, %v101_v2  ;;  %s107_s7 = scalar_lea.vmem [#allocation2], %s99_s29  ;;  %s133_s17 = sld [smem:[#allocation8 + %s130_s2]]  ;;  %v471_v2 = vpack.c.bf16 (%p92_p9), %v257_v0, %v256_v63  ;;  %468 = vmatprep.subr.bf16.mxu0 (%p92_p9), %v467_v61 }
  0x44   : > { %v105_v5 = vmul.f32 0.5, %v104_v3  ;;  %v108_v6 = vld [vmem:[%s107_s7] sm:$0x1]  ;;  %s117_s12 = scalar_lea.vmem [#allocation2], %s114_s8  ;;  %s148_s21 = sld [smem:[#allocation6 + %s147_s20]]  ;;  %v240_v3 = vld [vmem:[#allocation9 + $0x10] sm:$0xff] (%p92_p9)  ;;  %470 = vmatpush3.bf16.msra.mxu0 (%p92_p9), %v469_v1 }
  0x45   : > { %s120_s13 = scalar_lea.vmem [#allocation2], %s115_s9  ;;  %s149_s22 = sld [smem:[#allocation7 + %s147_s20]]  ;;  %472 = vmatprep.subr.bf16.mxu0 (%p92_p9), %v471_v2 }
  0x46   : > { %v106_v7 = vadd.f32 %v105_v5, %v102_v4  ;;  %s124_s16 = scalar_lea.vmem [#allocation2], %s116_s11  ;;  %s150_s24 = sld [smem:[#allocation8 + %s147_s20]]  ;;  %v241_v4 = vld [vmem:[#allocation9 + $0x18] sm:$0xff] (%p92_p9)  ;;  %v258_v5 = vld [vmem:[#allocation9 + $0xa0] sm:$0xff] (%p92_p9) }
  0x47   : > { %s134_s18 = scalar_lea.vmem [#allocation2], %s131_s14  ;;  %s164_s3 = sadd.s32 4, %s661_s5 }
  0x48   : > { %v109_v8 = vadd.f32 %v108_v6, %v106_v7  ;;  %s137_s19 = scalar_lea.vmem [#allocation2], %s132_s15  ;;  %s165_s28 = sld [smem:[#allocation6 + %s164_s3]]  ;;  %v259_v6 = vld [vmem:[#allocation9 + $0xa8] sm:$0xff] (%p92_p9)  ;;  %v473_v7 = vpack.c.bf16 (%p92_p9), %v241_v4, %v240_v3 }
  0x49   : > { %s141_s23 = scalar_lea.vmem [#allocation2], %s133_s17  ;;  %s166_s29 = sld [smem:[#allocation7 + %s164_s3]] }
  0x4a   : > { %416 = vst [vmem:[%s668_s10 + $0x10] sm:$0x1] %v109_v8  ;;  %s151_s25 = scalar_lea.vmem [#allocation2], %s148_s21  ;;  %s167_s1 = sld [smem:[#allocation8 + %s164_s3]]  ;;  %v475_v8 = vpack.c.bf16 (%p92_p9), %v259_v6, %v258_v5  ;;  %474 = vmatpush3.bf16.msra.mxu0 (%p92_p9), %v473_v7 }
  0x4b   : > { %s154_s26 = scalar_lea.vmem [#allocation2], %s149_s22  ;;  %s181_s8 = sadd.s32 5, %s661_s5 }
  0x4c   : > { %s158_s0 = scalar_lea.vmem [#allocation2], %s150_s24  ;;  %s182_s9 = sld [smem:[#allocation6 + %s181_s8]]  ;;  %476 = vmatprep.subr.bf16.mxu0 (%p92_p9), %v475_v8 }
  0x4d   : > { %s183_s11 = sld [smem:[#allocation7 + %s181_s8]]  ;;  %s198_s15 = sadd.s32 6, %s661_s5 }
  0x4e   : > { %s168_s30 = scalar_lea.vmem [#allocation2], %s165_s28  ;;  %s200_s17 = sld [smem:[#allocation7 + %s198_s15]] }
  0x4f   : > { %s171_s7 = scalar_lea.vmem [#allocation2], %s166_s29  ;;  %s215_s22 = sadd.s32 7, %s661_s5 }
  0x50   : > { %s217_s24 = sld [smem:[#allocation7 + %s215_s22]] }
  0x51   : > { %v118_v9 = vld [vmem:[%s117_s12] sm:$0x1]  ;;  %s175_s12 = scalar_lea.vmem [#allocation2], %s167_s1 }
  0x52   : > { %v121_v10 = vld [vmem:[%s120_s13] sm:$0x1]  ;;  %v119_v11 = vmul.f32 0.5, %v118_v9  ;;  %s184_s13 = sld [smem:[#allocation8 + %s181_s8]]  ;;  %s185_s2 = scalar_lea.vmem [#allocation2], %s182_s9 }
  0x53   : > { %v122_v12 = vmul.f32 0.5, %v121_v10  ;;  %v125_v14 = vld [vmem:[%s124_s16] sm:$0x1]  ;;  %s188_s14 = scalar_lea.vmem [#allocation2], %s183_s11  ;;  %s199_s16 = sld [smem:[#allocation6 + %s198_s15]]  ;;  %v243_v10 = vld [vmem:[#allocation9 + $0x28] sm:$0xff] (%p92_p9) }
  0x54   : > { %s205_s21 = scalar_lea.vmem [#allocation2], %s200_s17  ;;  %v242_v9 = vld [vmem:[#allocation9 + $0x20] sm:$0xff] (%p92_p9) }
  0x55   : > { %v123_v13 = vadd.f32 %v122_v12, %v119_v11  ;;  %v260_v11 = vld [vmem:[#allocation9 + $0xb0] sm:$0xff] (%p92_p9)  ;;  %v261_v12 = vld [vmem:[#allocation9 + $0xb8] sm:$0xff] (%p92_p9) }
  0x56   : > { %s222_s28 = scalar_lea.vmem [#allocation2], %s217_s24 }
  0x57   : > { %v126_v15 = vadd.f32 %v125_v14, %v123_v13  ;;  %v477_v13 = vpack.c.bf16 (%p92_p9), %v243_v10, %v242_v9  ;;  %v479_v14 = vpack.c.bf16 (%p92_p9), %v261_v12, %v260_v11 }
  0x59   : > { %418 = vst [vmem:[%s668_s10 + $0x11] sm:$0x1] %v126_v15  ;;  %s202_s20 = scalar_lea.vmem [#allocation2], %s199_s16  ;;  %v244_v15 = vld [vmem:[#allocation9 + $0x30] sm:$0xff] (%p92_p9)  ;;  %478 = vmatpush3.bf16.msra.mxu0 (%p92_p9), %v477_v13 }
  0x5a   :  { %480 = vmatprep.subr.bf16.mxu0 (%p92_p9), %v479_v14 }
  0x60   : > { %v135_v16 = vld [vmem:[%s134_s18] sm:$0x1]  ;;  %s192_s18 = scalar_lea.vmem [#allocation2], %s184_s13 }
  0x61   : > { %v138_v17 = vld [vmem:[%s137_s19] sm:$0x1]  ;;  %v136_v18 = vmul.f32 0.5, %v135_v16  ;;  %s201_s19 = sld [smem:[#allocation8 + %s198_s15]]  ;;  %v245_v16 = vld [vmem:[#allocation9 + $0x38] sm:$0xff] (%p92_p9) }
  0x62   : > { %v139_v19 = vmul.f32 0.5, %v138_v17  ;;  %v142_v21 = vld [vmem:[%s141_s23] sm:$0x1]  ;;  %s216_s23 = sld [smem:[#allocation6 + %s215_s22]] }
  0x63   :  { %v262_v17 = vld [vmem:[#allocation9 + $0xc0] sm:$0xff] (%p92_p9) }
  0x64   : > { %v140_v20 = vadd.f32 %v139_v19, %v136_v18  ;;  %v263_v18 = vld [vmem:[#allocation9 + $0xc8] sm:$0xff] (%p92_p9)  ;;  %v234_v19 = vld [vmem:[%s695_s4] sm:$0xff] (%p92_p9) }
  0x65   :  { %334 = vmatprep.mubr.f32.mxu0 (%p92_p9), %v234_v19 }
  0x66   : > { %v143_v22 = vadd.f32 %v142_v21, %v140_v20  ;;  %v481_v20 = vpack.c.bf16 (%p92_p9), %v245_v16, %v244_v15  ;;  %v483_v21 = vpack.c.bf16 (%p92_p9), %v263_v18, %v262_v17 }
  0x68   : > { %420 = vst [vmem:[%s668_s10 + $0x12] sm:$0x1] %v143_v22  ;;  %s219_s3 = scalar_lea.vmem [#allocation2], %s216_s23  ;;  %v246_v22 = vld [vmem:[#allocation9 + $0x40] sm:$0xff] (%p92_p9)  ;;  %482 = vmatpush3.bf16.msra.mxu0 (%p92_p9), %v481_v20 }
  0x69   :  { %484 = vmatprep.subr.bf16.mxu0 (%p92_p9), %v483_v21 }
  0x6f   : > { %v152_v23 = vld [vmem:[%s151_s25] sm:$0x1]  ;;  %s209_s25 = scalar_lea.vmem [#allocation2], %s201_s19 }
  0x70   : > { %v155_v24 = vld [vmem:[%s154_s26] sm:$0x1]  ;;  %v153_v25 = vmul.f32 0.5, %v152_v23  ;;  %s218_s26 = sld [smem:[#allocation8 + %s215_s22]]  ;;  %v247_v23 = vld [vmem:[#allocation9 + $0x48] sm:$0xff] (%p92_p9) }
  0x71   : > { %v156_v26 = vmul.f32 0.5, %v155_v24  ;;  %v159_v28 = vld [vmem:[%s158_s0] sm:$0x1]  ;;  %v264_v24 = vld [vmem:[#allocation9 + $0xd0] sm:$0xff] (%p92_p9) }
  0x73   : > { %v157_v27 = vadd.f32 %v156_v26, %v153_v25  ;;  %v265_v25 = vld [vmem:[#allocation9 + $0xd8] sm:$0xff] (%p92_p9)  ;;  %v485_v26 = vpack.c.bf16 (%p92_p9), %v247_v23, %v246_v22 }
  0x75   : > { %v160_v29 = vadd.f32 %v159_v28, %v157_v27  ;;  %v487_v27 = vpack.c.bf16 (%p92_p9), %v265_v25, %v264_v24  ;;  %v248_v28 = vld [vmem:[#allocation9 + $0x50] sm:$0xff] (%p92_p9)  ;;  %486 = vmatpush3.bf16.msra.mxu0 (%p92_p9), %v485_v26 }
  0x76   : > { %s226_s29 = scalar_lea.vmem [#allocation2], %s218_s26 }
  0x77   : > { %422 = vst [vmem:[%s668_s10 + $0x13] sm:$0x1] %v160_v29  ;;  %v249_v29 = vld [vmem:[#allocation9 + $0x58] sm:$0xff] (%p92_p9)  ;;  %488 = vmatprep.subr.bf16.mxu0 (%p92_p9), %v487_v27 }
  0x7e   : > { %v169_v30 = vld [vmem:[%s168_s30] sm:$0x1] }
  0x7f   : > { %v172_v31 = vld [vmem:[%s171_s7] sm:$0x1]  ;;  %v170_v32 = vmul.f32 0.5, %v169_v30 }
  0x80   : > { %v173_v33 = vmul.f32 0.5, %v172_v31  ;;  %v176_v35 = vld [vmem:[%s175_s12] sm:$0x1]  ;;  %v267_v31 = vld [vmem:[#allocation9 + $0xe8] sm:$0xff] (%p92_p9) }
  0x81   :  { %v266_v30 = vld [vmem:[#allocation9 + $0xe0] sm:$0xff] (%p92_p9) }
  0x82   : > { %v174_v34 = vadd.f32 %v173_v33, %v170_v32  ;;  %v489_v32 = vpack.c.bf16 (%p92_p9), %v249_v29, %v248_v28  ;;  %v491_v33 = vpack.c.bf16 (%p92_p9), %v267_v31, %v266_v30 }
  0x84   : > { %v177_v36 = vadd.f32 %v176_v35, %v174_v34  ;;  %v250_v34 = vld [vmem:[#allocation9 + $0x60] sm:$0xff] (%p92_p9)  ;;  %v251_v35 = vld [vmem:[#allocation9 + $0x68] sm:$0xff] (%p92_p9)  ;;  %490 = vmatpush3.bf16.msra.mxu0 (%p92_p9), %v489_v32 }
  0x85   :  { %492 = vmatprep.subr.bf16.mxu0 (%p92_p9), %v491_v33 }
  0x86   : > { %424 = vst [vmem:[%s668_s10 + $0x14] sm:$0x1] %v177_v36  ;;  %v268_v36 = vld [vmem:[#allocation9 + $0xf0] sm:$0xff] (%p92_p9) }
  0x8d   : > { %v186_v37 = vld [vmem:[%s185_s2] sm:$0x1] }
  0x8e   : > { %v189_v38 = vld [vmem:[%s188_s14] sm:$0x1]  ;;  %v187_v39 = vmul.f32 0.5, %v186_v37  ;;  %v269_v37 = vld [vmem:[#allocation9 + $0xf8] sm:$0xff] (%p92_p9) }
  0x8f   : > { %v190_v40 = vmul.f32 0.5, %v189_v38  ;;  %v193_v42 = vld [vmem:[%s192_s18] sm:$0x1]  ;;  %v493_v38 = vpack.c.bf16 (%p92_p9), %v251_v35, %v250_v34 }
  0x91   : > { %v191_v41 = vadd.f32 %v190_v40, %v187_v39  ;;  %v495_v39 = vpack.c.bf16 (%p92_p9), %v269_v37, %v268_v36  ;;  %v252_v40 = vld [vmem:[#allocation9 + $0x70] sm:$0xff] (%p92_p9)  ;;  %494 = vmatpush3.bf16.msra.mxu0 (%p92_p9), %v493_v38 }
  0x93   : > { %v194_v43 = vadd.f32 %v193_v42, %v191_v41  ;;  %v253_v41 = vld [vmem:[#allocation9 + $0x78] sm:$0xff] (%p92_p9)  ;;  %496 = vmatprep.subr.bf16.mxu0 (%p92_p9), %v495_v39 }
  0x94   :  { %v497_v42 = vpack.c.bf16 (%p92_p9), %v253_v41, %v252_v40 }
  0x95   : > { %426 = vst [vmem:[%s668_s10 + $0x15] sm:$0x1] %v194_v43 }
  0x96   :  { %498 = vmatpush3.bf16.msra.mxu0 (%p92_p9), %v497_v42 }
  0x9c   : > { %v203_v44 = vld [vmem:[%s202_s20] sm:$0x1] }
  0x9d   : > { %v206_v45 = vld [vmem:[%s205_s21] sm:$0x1]  ;;  %v204_v46 = vmul.f32 0.5, %v203_v44 }
  0x9e   : > { %v207_v47 = vmul.f32 0.5, %v206_v45  ;;  %v210_v49 = vld [vmem:[%s209_s25] sm:$0x1] }
  0xa0   : > { %v208_v48 = vadd.f32 %v207_v47, %v204_v46 }
  0xa2   : > { %v211_v50 = vadd.f32 %v210_v49, %v208_v48 }
  0xa4   : > { %428 = vst [vmem:[%s668_s10 + $0x16] sm:$0x1] %v211_v50 }
  0xab   : > { %v220_v51 = vld [vmem:[%s219_s3] sm:$0x1] }
  0xac   : > { %v223_v52 = vld [vmem:[%s222_s28] sm:$0x1]  ;;  %v221_v53 = vmul.f32 0.5, %v220_v51 }
  0xad   : > { %v224_v54 = vmul.f32 0.5, %v223_v52  ;;  %v227_v56 = vld [vmem:[%s226_s29] sm:$0x1]  ;;  %94 = sbr.rel (!%p92_p9) target bundleno = 58 (0x3a), region = 113 }
  0xaf   : > { %v225_v55 = vadd.f32 %v224_v54, %v221_v53 }
  0xb1   : > { %v228_v57 = vadd.f32 %v227_v56, %v225_v55 }
  0xb3   : > { %430 = vst [vmem:[%s668_s10 + $0x17] sm:$0x1] %v228_v57 }
  0xba   :  { %v232_v43 = vld [vmem:[#allocation2 + $0x18] sm:$0xff] }
  0xbb   :  { %335 = vmatmul.mubr.f32.vlgmr.msra.gmra.mrb[0].mxu0 %v232_v43 }
 0x18e   :  { %v464_v44 = vpop.f32.mrb[0].mxu0 }
 0x18f   :  { %v465_v45 = vpop.f32.mrb[1].mxu0 }
 0x190   :  { %v466_v46 = vadd.f32 %v465_v45, %v464_v44 }
 0x192   :  { %513 = vtanh.f32 %v466_v46 }
 0x19c   :  { %v514_v47 = vpop.eup %513 }
 0x19d   :  { %341 = vst [vmem:[%s697_s6] sm:$0xff] %v514_v47 }
 0x19e   :  { %346 = vsyncpa [#allocation10], 1 }
 0x19f   :  { %347 = vsyncmov [#allocation4] }
 0x1a2   :  { %s348_s0 = vpop.sfrf %347 }
 0x1a3   :  { %p431_p10 = scmp.ne.s32.totalorder %s348_s0, 0 }
 0x1a5   :  { %352 = shalt.err (%p431_p10)  }

</bundles_post_ra>
